<compile_context>
chip_gen: v7x
topology: tpu7x:2x2x1
jax: 0.10.0
libtpu: 0.0.40
codegen_flags: <defaults>
</compile_context>

<pallas_src>
import functools

import jax
import jax.numpy as jnp
from jax.experimental import pallas as pl
from jax.experimental.pallas import tpu as pltpu

LANES = 128
SUBLANES = 8
_DEFAULT_BLOCK_BYTES = 2 * 1024 * 1024    # per-input tile, 1-TC chips
_MULTICORE_BLOCK_BYTES = 4 * 1024 * 1024  # per-input tile, 2-TC chips (v7x)


def _num_tensorcore_shards():
    """Best-effort TensorCores-per-chip (2 on v4/v5p/v7x, else 1)."""
    try:
        kind = jax.devices()[0].device_kind.lower()
    except Exception:
        return 1
    if "v4" in kind or "v5p" in kind or "v7" in kind:
        return 2
    return 1


def _charbonnier_kernel(x_ref, y_ref, o_ref, *, eps, rows, block_rows,
                        n_blocks, bps):
    c = pl.program_id(0)   # shard axis (TensorCores on multi-TC chips)
    j = pl.program_id(1)   # block within shard (sequential reduction axis)
    g = c * bps + j        # global row-block index

    # Zero this shard's resident accumulator (the output block itself).
    @pl.when(j == 0)
    def _init():
        o_ref[...] = jnp.zeros_like(o_ref)

    def tile_value():
        # Inputs stream in their native dtype; upcast in VMEM.
        xv = x_ref[...].astype(jnp.float32)
        yv = y_ref[...].astype(jnp.float32)
        d = xv - yv
        return jnp.sqrt(d * d + eps)

    def accumulate(val):
        # Reduce (block_rows, 128) -> vreg-sized (8, 128) partial, fold into
        # the resident output block. Tile-aligned reshape => no relayout.
        o_ref[...] += val.reshape(block_rows // SUBLANES, SUBLANES,
                                  LANES).sum(axis=0)

    # Full, in-range blocks: no masking work at all.
    @pl.when(g < n_blocks - 1)
    def _bulk():
        accumulate(tile_value())

    # Final block only: may be partial, so row-mask out-of-range rows via
    # jnp.where (select discards NaN/Inf from padded garbage rows). Padded
    # idle-shard steps (g >= n_blocks) hit neither branch.
    @pl.when(g == n_blocks - 1)
    def _last():
        val = tile_value()
        row = jax.lax.broadcasted_iota(jnp.int32, val.shape, 0) + g * block_rows
        accumulate(jnp.where(row < rows, val, 0.0))


def charbonnier_loss(x, y, eps=1e-6, block_bytes=None):
    assert x.shape == y.shape
    total = x.size
    xf = jnp.ravel(x)
    yf = jnp.ravel(y)

    # Dtype-aware packing: rows per tile must be a multiple of the sublane
    # packing of the *narrowest* input dtype (8 f32, 16 bf16, 32 int8/fp8).
    isz_x = max(1, jnp.dtype(x.dtype).itemsize)
    isz_y = max(1, jnp.dtype(y.dtype).itemsize)
    packing = max(max(1, 4 // isz_x), max(1, 4 // isz_y))
    size_itemsize = max(isz_x, isz_y)         # for VMEM-byte budgeting
    row_chunk = SUBLANES * packing
    chunk = row_chunk * LANES                  # elements per minimal tile

    bulk = (total // chunk) * chunk            # handled by the kernel
    tail = total - bulk                        # < chunk elements, plain JAX

    loss = jnp.zeros((), jnp.float32)

    if bulk > 0:
        rows = bulk // LANES                   # multiple of row_chunk
        num_cores = _num_tensorcore_shards()

        if block_bytes is None:
            block_bytes = (_MULTICORE_BLOCK_BYTES if num_cores > 1
                           else _DEFAULT_BLOCK_BYTES)
        target_rows = (block_bytes // (LANES * size_itemsize))
        target_rows = max(row_chunk, (target_rows // row_chunk) * row_chunk)

        block_rows = min(target_rows, rows)
        n_blocks = pl.cdiv(rows, block_rows)
        num_shards = max(1, min(num_cores, n_blocks))
        bps = pl.cdiv(n_blocks, num_shards)    # blocks per shard

        # Common case (total % chunk == 0): metadata-only reshape. Ragged
        # case: slice+reshape; allow_input_fusion below lets XLA fuse it into
        # the kernel operands instead of materializing an HBM copy.
        if tail:
            x2d = xf[:bulk].reshape(rows, LANES)
            y2d = yf[:bulk].reshape(rows, LANES)
        else:
            x2d = xf.reshape(rows, LANES)
            y2d = yf.reshape(rows, LANES)

        if num_shards * bps == n_blocks:
            # Even split: no clamp needed in the index map.
            def in_map(c, j):
                return (c * bps + j, 0)
        else:
            # Idle padded steps on the last shard clamp to a valid block; the
            # kernel skips their accumulation via the g < n_blocks gate.
            def in_map(c, j):
                return (jnp.minimum(c * bps + j, n_blocks - 1), 0)

        kernel = functools.partial(
            _charbonnier_kernel, eps=eps, rows=rows, block_rows=block_rows,
            n_blocks=n_blocks, bps=bps)

        partials = pl.pallas_call(
            kernel,
            out_shape=jax.ShapeDtypeStruct((num_shards * SUBLANES, LANES),
                                           jnp.float32),
            grid_spec=pltpu.PrefetchScalarGridSpec(
                num_scalar_prefetch=0,
                grid=(num_shards, bps),
                in_specs=[
                    pl.BlockSpec((block_rows, LANES), in_map),
                    pl.BlockSpec((block_rows, LANES), in_map),
                ],
                out_specs=pl.BlockSpec((SUBLANES, LANES), lambda c, j: (c, 0)),
            ),
            compiler_params=pltpu.CompilerParams(
                dimension_semantics=("parallel", "arbitrary"),
                vmem_limit_bytes=32 << 20,
                allow_input_fusion=[True, True],
            ),
        )(x2d, y2d)

        loss = loss + jnp.sum(partials)

    if tail:
        xt = xf[bulk:].astype(jnp.float32)
        yt = yf[bulk:].astype(jnp.float32)
        dt = xt - yt
        loss = loss + jnp.sum(jnp.sqrt(dt * dt + eps))

    return loss


def _ref_loss(x, y, eps):
    d = x.astype(jnp.float32) - y.astype(jnp.float32)
    return jnp.sum(jnp.sqrt(d * d + eps))


if __name__ == "__main__":
    key = jax.random.PRNGKey(0)
    kx, ky = jax.random.split(key)

    # 1) NCHW inputs, consistent with the PyTorch module's typical usage.
    x = jax.random.normal(kx, (2, 4, 16, 16), dtype=jnp.float32)
    y = jax.random.normal(ky, (2, 4, 16, 16), dtype=jnp.float32)
    loss = charbonnier_loss(x, y, eps=1e-6)
    jax.block_until_ready(loss)
    assert jnp.allclose(loss, _ref_loss(x, y, 1e-6), rtol=1e-5, atol=1e-4), (
        loss, _ref_loss(x, y, 1e-6))

    # 2) Ragged shape: kernel bulk + plain-JAX tail path (fused slice).
    kx2, ky2 = jax.random.split(ky)
    x2 = jax.random.normal(kx2, (3, 3, 17, 19), dtype=jnp.float32)
    y2 = jax.random.normal(ky2, (3, 3, 17, 19), dtype=jnp.float32)
    loss2 = charbonnier_loss(x2, y2, eps=1e-6)
    jax.block_until_ready(loss2)
    assert jnp.allclose(loss2, _ref_loss(x2, y2, 1e-6), rtol=1e-5, atol=1e-4), (
        loss2, _ref_loss(x2, y2, 1e-6))

    # 3) Multi-block + masked partial last block + tail (small block override).
    kx3, ky3 = jax.random.split(kx2)
    x3 = jax.random.normal(kx3, (2, 4, 100, 130), dtype=jnp.float32)
    y3 = jax.random.normal(ky3, (2, 4, 100, 130), dtype=jnp.float32)
    loss3 = charbonnier_loss(x3, y3, eps=1e-6, block_bytes=64 * 1024)
    jax.block_until_ready(loss3)
    assert jnp.allclose(loss3, _ref_loss(x3, y3, 1e-6), rtol=1e-5, atol=1e-3), (
        loss3, _ref_loss(x3, y3, 1e-6))

    # 4) bf16 inputs: dtype-aware (16-row) packing, in-kernel upcast.
    kx4, ky4 = jax.random.split(ky3)
    x4 = jax.random.normal(kx4, (2, 4, 16, 16), dtype=jnp.bfloat16)
    y4 = jax.random.normal(ky4, (2, 4, 16, 16), dtype=jnp.bfloat16)
    loss4 = charbonnier_loss(x4, y4, eps=1e-6)
    jax.block_until_ready(loss4)
    assert jnp.allclose(loss4, _ref_loss(x4, y4, 1e-6), rtol=1e-5, atol=1e-3), (
        loss4, _ref_loss(x4, y4, 1e-6))

    print("KERNEL_OK")
</pallas_src>

<mosaic_0001>
module attributes {stable_mosaic.version = 11 : i64} {
  func.func @_charbonnier_kernel(%arg0: i32, %arg1: i32, %arg2: memref<16x128xf32, #tpu.memory_space<vmem>>, %arg3: memref<16x128xf32, #tpu.memory_space<vmem>>, %arg4: memref<8x128xf32, #tpu.memory_space<vmem>>) attributes {dimension_semantics = [#tpu.dimension_semantics<parallel>, #tpu.dimension_semantics<arbitrary>], iteration_bounds = array<i64: 1, 1>, scalar_prefetch = 0 : i64, scratch_operands = 0 : i64, tpu.core_type = #tpu.core_type<tc>, window_params = [{transform_indices = @transform_0, window_bounds = array<i64: 16, 128>}, {transform_indices = @transform_1, window_bounds = array<i64: 16, 128>}, {transform_indices = @transform_2, window_bounds = array<i64: 8, 128>}]} {
    %c1_i32 = arith.constant 1 : i32
    %0 = arith.muli %arg0, %c1_i32 : i32
    %1 = arith.addi %0, %arg1 : i32
    %c0_i32 = arith.constant 0 : i32
    %2 = arith.cmpi eq, %arg1, %c0_i32 : i32
    %3 = arith.extui %2 : i1 to i32
    %c0_i32_0 = arith.constant 0 : i32
    %4 = arith.cmpi ne, %3, %c0_i32_0 : i32
    scf.if %4 {
      %cst = arith.constant 0.000000e+00 : f32
      %11 = vector.broadcast %cst : f32 to vector<8x128xf32>
      %c0 = arith.constant 0 : index
      %c0_5 = arith.constant 0 : index
      %12 = vector.load %arg4[%c0, %c0_5] : memref<8x128xf32, #tpu.memory_space<vmem>>, vector<8x128xf32>
      tpu.vector_store %arg4[%c0, %c0_5], %11 {strides = array<i32>} : memref<8x128xf32, #tpu.memory_space<vmem>>, vector<8x128xf32>,
    } else {
    }
    %c0_i32_1 = arith.constant 0 : i32
    %5 = arith.cmpi slt, %1, %c0_i32_1 : i32
    %6 = arith.extui %5 : i1 to i32
    %c0_i32_2 = arith.constant 0 : i32
    %7 = arith.cmpi ne, %6, %c0_i32_2 : i32
    scf.if %7 {
      %c0 = arith.constant 0 : index
      %c0_5 = arith.constant 0 : index
      %11 = vector.load %arg2[%c0, %c0_5] : memref<16x128xf32, #tpu.memory_space<vmem>>, vector<16x128xf32>
      %c0_6 = arith.constant 0 : index
      %c0_7 = arith.constant 0 : index
      %12 = vector.load %arg3[%c0_6, %c0_7] : memref<16x128xf32, #tpu.memory_space<vmem>>, vector<16x128xf32>
      %13 = arith.subf %11, %12 : vector<16x128xf32>
      %14 = arith.mulf %13, %13 : vector<16x128xf32>
      %cst = arith.constant 9.99999997E-7 : f32
      %15 = vector.broadcast %cst : f32 to vector<16x128xf32>
      %16 = arith.addf %14, %15 : vector<16x128xf32>
      %17 = math.sqrt %16 : vector<16x128xf32>
      %c0_8 = arith.constant 0 : index
      %c0_9 = arith.constant 0 : index
      %18 = vector.load %arg4[%c0_8, %c0_9] : memref<8x128xf32, #tpu.memory_space<vmem>>, vector<8x128xf32>
      %19 = vector.shape_cast %17 : vector<16x128xf32> to vector<2x8x128xf32>
      %cst_10 = arith.constant dense<0.000000e+00> : vector<8x128xf32>
      %20 = vector.multi_reduction <add>, %19, %cst_10 [0] : vector<2x8x128xf32> to vector<8x128xf32>
      %21 = arith.addf %18, %20 : vector<8x128xf32>
      %c0_11 = arith.constant 0 : index
      %c0_12 = arith.constant 0 : index
      %22 = vector.load %arg4[%c0_11, %c0_12] : memref<8x128xf32, #tpu.memory_space<vmem>>, vector<8x128xf32>
      tpu.vector_store %arg4[%c0_11, %c0_12], %21 {strides = array<i32>} : memref<8x128xf32, #tpu.memory_space<vmem>>, vector<8x128xf32>,
    } else {
    }
    %c0_i32_3 = arith.constant 0 : i32
    %8 = arith.cmpi eq, %1, %c0_i32_3 : i32
    %9 = arith.extui %8 : i1 to i32
    %c0_i32_4 = arith.constant 0 : i32
    %10 = arith.cmpi ne, %9, %c0_i32_4 : i32
    scf.if %10 {
      %c0 = arith.constant 0 : index
      %c0_5 = arith.constant 0 : index
      %11 = vector.load %arg2[%c0, %c0_5] : memref<16x128xf32, #tpu.memory_space<vmem>>, vector<16x128xf32>
      %c0_6 = arith.constant 0 : index
      %c0_7 = arith.constant 0 : index
      %12 = vector.load %arg3[%c0_6, %c0_7] : memref<16x128xf32, #tpu.memory_space<vmem>>, vector<16x128xf32>
      %13 = arith.subf %11, %12 : vector<16x128xf32>
      %14 = arith.mulf %13, %13 : vector<16x128xf32>
      %cst = arith.constant 9.99999997E-7 : f32
      %15 = vector.broadcast %cst : f32 to vector<16x128xf32>
      %16 = arith.addf %14, %15 : vector<16x128xf32>
      %17 = math.sqrt %16 : vector<16x128xf32>
      %18 = tpu.iota {dimensions = array<i32: 0>} : vector<16x128xi32>
      %c16_i32 = arith.constant 16 : i32
      %19 = arith.muli %1, %c16_i32 : i32
      %20 = vector.broadcast %19 : i32 to vector<16x128xi32>
      %21 = arith.addi %18, %20 : vector<16x128xi32>
      %c16_i32_8 = arith.constant 16 : i32
      %22 = vector.broadcast %c16_i32_8 : i32 to vector<16x128xi32>
      %23 = arith.cmpi slt, %21, %22 : vector<16x128xi32>
      %cst_9 = arith.constant 0.000000e+00 : f32
      %24 = vector.broadcast %cst_9 : f32 to vector<16x128xf32>
      %25 = arith.select %23, %17, %24 : vector<16x128xi1>, vector<16x128xf32>
      %c0_10 = arith.constant 0 : index
      %c0_11 = arith.constant 0 : index
      %26 = vector.load %arg4[%c0_10, %c0_11] : memref<8x128xf32, #tpu.memory_space<vmem>>, vector<8x128xf32>
      %27 = vector.shape_cast %25 : vector<16x128xf32> to vector<2x8x128xf32>
      %cst_12 = arith.constant dense<0.000000e+00> : vector<8x128xf32>
      %28 = vector.multi_reduction <add>, %27, %cst_12 [0] : vector<2x8x128xf32> to vector<8x128xf32>
      %29 = arith.addf %26, %28 : vector<8x128xf32>
      %c0_13 = arith.constant 0 : index
      %c0_14 = arith.constant 0 : index
      %30 = vector.load %arg4[%c0_13, %c0_14] : memref<8x128xf32, #tpu.memory_space<vmem>>, vector<8x128xf32>
      tpu.vector_store %arg4[%c0_13, %c0_14], %29 {strides = array<i32>} : memref<8x128xf32, #tpu.memory_space<vmem>>, vector<8x128xf32>,
    } else {
    }
    return
  }
  func.func @transform_0(%arg0: i32, %arg1: i32) -> (i32, i32) {
    %c1_i32 = arith.constant 1 : i32
    %0 = arith.muli %arg0, %c1_i32 : i32
    %1 = arith.addi %0, %arg1 : i32
    %c0_i32 = arith.constant 0 : i32
    %c0_i32_0 = arith.constant 0 : i32
    return %1, %c0_i32 : i32, i32
  }
  func.func @transform_1(%arg0: i32, %arg1: i32) -> (i32, i32) {
    %c1_i32 = arith.constant 1 : i32
    %0 = arith.muli %arg0, %c1_i32 : i32
    %1 = arith.addi %0, %arg1 : i32
    %c0_i32 = arith.constant 0 : i32
    %c0_i32_0 = arith.constant 0 : i32
    return %1, %c0_i32 : i32, i32
  }
  func.func @transform_2(%arg0: i32, %arg1: i32) -> (i32, i32) {
    %c0_i32 = arith.constant 0 : i32
    %c0_i32_0 = arith.constant 0 : i32
    return %arg0, %c0_i32 : i32, i32
  }
}

</mosaic_0001>

<bundles_post_ra>
// kernel: tpu_custom_call.1
= control target key start
LH: loop header
LB: loop body
LE: loop exit
PB: predicated region body
PF: predicated region fallthrough
CT: control target
= control target key end

     0   :  { %7 = vsyncpa [#allocation3], 0  ;;  %s287_s0 = inlined_call_operand.hbm [shape: f32[16,128], index: 0, kind: input, shape index: {}]   ;;  %s288_s1 = inlined_call_operand.hbm [shape: f32[16,128], index: 1, kind: input, shape index: {}]   ;;  %s289_s2 = inlined_call_operand.hbm [shape: f32[8,128], index: 2, kind: output, shape index: {}]  }
   0x1   :  { %8 = vsyncpa [#allocation6], 0 }
   0x2   :  { %9 = vsyncpa [#allocation4], 0  ;;  %s231_s9 = smov [#allocation2]   ;;  %s159_s13 = scalar_lea.hbm %s287_s0, 256 }
   0x3   :  { %s19_s10 = sshll.u32 %s231_s9, 4  ;;  %p160_p0 = scmp.ne.s32.totalorder %s287_s0, %s159_s13  ;;  %s20_s10 = int_to_ptr.vmem [resolvable:$true] %s19_s10 }
   0x4   :  { %p163_p1 = scmp.lt.u32.totalorder %s159_s13, %s287_s0 }
   0x6   :  { %p165_p2 = pnand %p163_p1, %p160_p0 }
   0x8   :  { %168 = shalt.err (!%p165_p2)
}
   0x9   :  { %s169_s18 = scalar_lea.vmem %s20_s10, 256  ;;  %p174_p4 = scmp.lt.s32.totalorder %s20_s10, %s20_s10 }
   0xa   :  { %p170_p3 = scmp.ne.s32.totalorder %s20_s10, %s169_s18  ;;  %p175_p5 = scmp.lt.s32.totalorder %s169_s18, %s169_s18 }
   0xc   :  { %p176_p6 = por %p175_p5, %p174_p4 }
   0xe   :  { %p177_p7 = pnand %p176_p6, %p170_p3 }
  0x10   :  { %180 = shalt.err (!%p177_p7)
}
  0x11   :  { %s232_s19 = smov 128   ;;  %s233_s20 = smov 8  }
  0x12   :  { %25 = dma.hbm_to_vmem [thread:$0]  %s287_s0, 256, %s20_s10, [#allocation3], %s232_s19, %s232_s19, %s233_s20  }
  0x13   :  { %s234_s23 = smov [#allocation5]   ;;  %s181_s27 = scalar_lea.hbm %s288_s1, 256 }
  0x14   :  { %s35_s24 = sshll.u32 %s234_s23, 4  ;;  %p182_p8 = scmp.ne.s32.totalorder %s288_s1, %s181_s27  ;;  %s36_s24 = int_to_ptr.vmem [resolvable:$true] %s35_s24 }
  0x15   :  { %p185_p9 = scmp.lt.u32.totalorder %s181_s27, %s288_s1 }
  0x17   :  { %p187_p10 = pnand %p185_p9, %p182_p8 }
  0x19   :  { %190 = shalt.err (!%p187_p10)
}
  0x1a   :  { %s191_s4 = scalar_lea.vmem %s36_s24, 256  ;;  %p196_p12 = scmp.lt.s32.totalorder %s36_s24, %s36_s24 }
  0x1b   :  { %p192_p11 = scmp.ne.s32.totalorder %s36_s24, %s191_s4  ;;  %p197_p13 = scmp.lt.s32.totalorder %s191_s4, %s191_s4 }
  0x1d   :  { %p198_p0 = por %p197_p13, %p196_p12 }
  0x1f   :  { %p199_p1 = pnand %p198_p0, %p192_p11 }
  0x21   :  { %202 = shalt.err (!%p199_p1)
}
  0x22   :  { %41 = dma.hbm_to_vmem [thread:$0]  %s288_s1, 256, %s36_s24, [#allocation6], %s232_s19, %s232_s19, %s233_s20  }
  0x23   :  { %225 = dma.done.wait [#allocation3], 256  }
  0x24   :  { %226 = vsyncadd [#allocation3], 4294967040 }
  0x25   :  { %227 = dma.done.wait [#allocation6], 256  }
  0x26   :  { %228 = vsyncadd [#allocation6], 4294967040  ;;  %v94_v0 = vld [vmem:[#allocation2] sm:$0xff]  ;;  %v95_v1 = vld [vmem:[#allocation2 + $0x8] sm:$0xff]  ;;  %s235_s1 = smov [#allocation7]  }
  0x27   :  { %v96_v2 = vld [vmem:[#allocation5] sm:$0xff]  ;;  %v97_v3 = vld [vmem:[#allocation5 + $0x8] sm:$0xff]  ;;  %s139_s6 = sshll.u32 %s235_s1, 4  ;;  %s140_s6 = int_to_ptr.vmem [resolvable:$true] %s139_s6 }
  0x28   :  { %v98_v4 = vsub.f32 %v94_v0, %v96_v2  ;;  %v99_v5 = vsub.f32 %v95_v1, %v97_v3  ;;  %s203_s7 = scalar_lea.vmem %s140_s6, 128  ;;  %p208_p3 = scmp.lt.s32.totalorder %s140_s6, %s140_s6 }
  0x29   :  { %p204_p2 = scmp.ne.s32.totalorder %s140_s6, %s203_s7  ;;  %p209_p4 = scmp.lt.s32.totalorder %s203_s7, %s203_s7 }
  0x2a   :  { %v100_v6 = vmul.f32 %v98_v4, %v98_v4  ;;  %v101_v7 = vmul.f32 %v99_v5, %v99_v5 }
  0x2b   :  { %p210_p5 = por %p209_p4, %p208_p3 }
  0x2c   :  { %v102_v8 = vadd.f32 1e-06, %v100_v6  ;;  %v103_v9 = vadd.f32 1e-06, %v101_v7 }
  0x2d   :  { %p211_p6 = pnand %p210_p5, %p204_p2 }
  0x2e   :  { %155 = vrsqrt.f32 %v102_v8  ;;  %vm106_vm0 = vcmp.eq.f32.partialorder %v102_v8, inf  ;;  %v109_v11 = vand.u32 2147483648, %v102_v8  ;;  %vm108_vm1 = vcmp.eq.f32.partialorder %v102_v8, 0.0 }
  0x2f   :  { %157 = vrsqrt.f32 %v103_v9  ;;  %vm113_vm2 = vcmp.eq.f32.partialorder %v103_v9, inf  ;;  %v116_v14 = vand.u32 2147483648, %v103_v9  ;;  %vm115_vm3 = vcmp.eq.f32.partialorder %v103_v9, 0.0 }
  0x38   :  { %v156_v10 = vpop.eup %155 }
  0x39   :  { %v158_v12 = vpop.eup %157  ;;  %v105_v13 = vmul.f32 %v156_v10, %v102_v8 }
  0x3a   :  { %v112_v15 = vmul.f32 %v158_v12, %v103_v9 }
  0x3b   :  { %v107_v16 = vsel %vm106_vm0, %v102_v8, %v105_v13 }
  0x3c   :  { %v110_v17 = vsel %vm108_vm1, %v109_v11, %v107_v16  ;;  %v114_v18 = vsel %vm113_vm2, %v103_v9, %v112_v15 }
  0x3d   :  { %v117_v19 = vsel %vm115_vm3, %v116_v14, %v114_v18 }
  0x3e   :  { %v130_v20 = vadd.f32 %v117_v19, %v110_v17 }
  0x40   :  { %132 = vst [vmem:[#allocation7] sm:$0xff] %v130_v20 }
  0x41   :  { %214 = shalt.err (!%p211_p6)
}
  0x42   :  { %s215_s10 = scalar_lea.hbm %s289_s2, 128 }
  0x43   :  { %p216_p7 = scmp.ne.s32.totalorder %s289_s2, %s215_s10  ;;  %p219_p8 = scmp.lt.u32.totalorder %s215_s10, %s289_s2 }
  0x45   :  { %p221_p9 = pnand %p219_p8, %p216_p7 }
  0x47   :  { %224 = shalt.err (!%p221_p9)
}
  0x48   :  { %142 = dma.vmem_to_hbm [thread:$0]  %s140_s6, 128, %s289_s2, [#allocation4]  }
  0x49   :  { %229 = dma.done.wait [#allocation4], 128  }
  0x4a   :  { %230 = vsyncadd [#allocation4], 4294967168 }
  0x4b   :  { %146 = vsyncpa [#allocation3], 1 }
  0x4c   :  { %147 = vsyncpa [#allocation6], 1 }
  0x4d   :  { %148 = vsyncpa [#allocation4], 1 }

</bundles_post_ra>
